<compile_context>
chip_gen: v7x
topology: tpu7x:2x2x1
jax: 0.10.0
libtpu: 0.0.40
codegen_flags: <defaults>
</compile_context>

<pallas_src>
import numpy as np
import jax
import jax.numpy as jnp
from jax.experimental import pallas as pl
from jax.experimental.pallas import tpu as pltpu

H = W = 24
INPUT_CHANNELS = 2
NCLASSES = 3
OUT_CHANNELS = [4, 8]
KERNEL_SIZE = 5
OUT_CONNECTED = [32, 16]          # FC head: 72 -> 32 (ReLU) -> 16 (ReLU) -> 3


def out_res(n_blocks, h, w):
    for _ in range(n_blocks):
        h = h // 2 - 2
        w = w // 2 - 2
    return h, w


# ---- static derived shapes ----
K = KERNEL_SIZE
C0, C1, C2 = INPUT_CHANNELS, OUT_CHANNELS[0], OUT_CHANNELS[1]
OH1, OW1 = H - K + 1, W - K + 1            # 20, 20  conv1 output
PH1, PW1 = OH1 // 2, OW1 // 2              # 10, 10  pool1 output
OH2, OW2 = PH1 - K + 1, PW1 - K + 1        # 6, 6    conv2 output
PH2, PW2 = OH2 // 2, OW2 // 2              # 3, 3    pool2 output
NSLOTS = PH2 * PW2                         # 9       spatial slots after block 2
FLAT = C2 * NSLOTS                         # 72      flattened features
F1, F2 = OUT_CONNECTED                     # 32, 16

CP1 = 8                                    # conv-1 Cout padded 4 -> 8 (sublane-aligned pool)
CP2 = C2                                   # conv-2 Cout is already 8
K1 = C0 * K * K                            # 50  im2col depth, block 1
K2 = C1 * K * K                            # 100 im2col depth, block 2


def _round_up(v, m):
    return (v + m - 1) // m * m


def _vmem():
    # tiny arrays: whole-array resident in VMEM, no grid tiling needed at this size
    return pl.BlockSpec(memory_space=pltpu.MemorySpace.VMEM)


def _block_diag(block, reps):
    """reps copies of `block` on the diagonal of a zero matrix (host-side, one-time)."""
    r, c = block.shape
    out = jnp.zeros((reps * r, reps * c), block.dtype)
    for q in range(reps):
        out = out.at[q * r:(q + 1) * r, q * c:(q + 1) * c].set(block)
    return out


# ----------------------------- Pallas kernels -----------------------------

def conv_block1_kernel(p1_ref, w1_ref, b1_ref, out_ref):
    """Conv2d + bias + ReLU + AvgPool2d(2,2) as ONE block-diagonal MXU push.

    p1:  (4*K1, L1) bf16 — pooling phases stacked along K, lanes = (i, j, n), zero-padded
    w1:  (4*CP1, 4*K1) bf16 block-diagonal   b1: (4*CP1, 1) f32
    out: (C1, L1) bf16, lane order (i, j, n)
    """
    y = jnp.dot(w1_ref[...], p1_ref[...], preferred_element_type=jnp.float32)
    y = jnp.maximum(y + b1_ref[...], 0.0)                         # bias + ReLU, one pass
    # 2x2 average pool = mean of the four 8-sublane-aligned phase slices (pure VPU)
    z = 0.25 * (y[0:CP1] + y[CP1:2 * CP1] + y[2 * CP1:3 * CP1] + y[3 * CP1:4 * CP1])
    out_ref[...] = z[:C1].astype(out_ref.dtype)                   # rows C1..CP1-1 are zero pad


def conv_block2_mlp_kernel(p2_ref, w2_ref, b2_ref,
                           w1f_ref, b1f_ref, w2f_ref, b2f_ref,
                           w3f_ref, b3f_ref, out_ref):
    """Conv block 2 (block-diag conv+bias+ReLU+avgpool) fused with the whole FC head.

    p2:  (4*K2, L2) bf16  w2: (4*CP2, 4*K2) bf16 block-diag  b2: (4*CP2, 1) f32
    w1f: (NSLOTS, F1, C2) f32 — fc1 weight regrouped per spatial slot
    w2f: (F2, F1)  w3f: (NCLASSES, F2), biases as (., 1)
    out: (NCLASSES, N) f32
    """
    n = out_ref.shape[1]

    # conv block 2: one MXU push, pooled over the four 8-row phase slices
    y = jnp.dot(w2_ref[...], p2_ref[...], preferred_element_type=jnp.float32)
    y = jnp.maximum(y + b2_ref[...], 0.0)
    z2 = 0.25 * (y[0:CP2] + y[CP2:2 * CP2] + y[2 * CP2:3 * CP2] + y[3 * CP2:4 * CP2])
    # z2: (C2, L2) register value (no VMEM scratch), valid lanes = s*N + n for s < NSLOTS

    # fc1 without any in-kernel transpose: h[j, n] = sum_s sum_c w1f[s, j, c] * z2[c, s*N+n]
    # NOTE: at this toy N the per-slot slices start at non-128-aligned lanes (cheap here);
    # at padded batch wrap the start in pl.multiple_of(s*n, 128) for aligned views.
    h = jnp.dot(w1f_ref[0], z2[:, 0:n], preferred_element_type=jnp.float32)
    for s in range(1, NSLOTS):
        h = h + jnp.dot(w1f_ref[s], z2[:, s * n:(s + 1) * n],
                        preferred_element_type=jnp.float32)
    h = jnp.maximum(h + b1f_ref[...], 0.0)                        # (F1, N)
    h = jnp.maximum(jnp.dot(w2f_ref[...], h, preferred_element_type=jnp.float32)
                    + b2f_ref[...], 0.0)                          # (F2, N)
    out_ref[...] = (jnp.dot(w3f_ref[...], h, preferred_element_type=jnp.float32)
                    + b3f_ref[...])                               # (NCLASSES, N)


# ------------------------------- JAX glue ---------------------------------

def _pool_phase_patches(x, k, ph, pw):
    """im2col with the 2x2 pooling phase as the leading axis, batch-minor lanes.

    x: (C, HH, WW, N) channels-major, batch-last input of a conv block.
    Returns (4, C*k*k, ph*pw*N) with value = x[c, 2*i + dh + kh, 2*j + dw + kw, n],
    q = 2*dh + dw, lane index = (i*pw + j)*N + n.
    Pure static strided slices + stacks: XLA fuses this into a small copy.
    """
    c = x.shape[0]
    q_parts = []
    for dh in range(2):
        for dw in range(2):
            taps = []
            for kh in range(k):
                for kw in range(k):
                    r0, c0 = dh + kh, dw + kw
                    taps.append(x[:, r0:r0 + 2 * (ph - 1) + 1:2,
                                  c0:c0 + 2 * (pw - 1) + 1:2, :])   # (C, ph, pw, N)
            t = jnp.stack(taps, axis=1)                             # (C, k*k, ph, pw, N)
            q_parts.append(t.reshape(c * k * k, -1))
    return jnp.stack(q_parts)                                       # (4, C*k*k, ph*pw*N)


def prepare_params(conv_params, fc_params):
    """One-time re-layout of torch-convention parameters (off the per-forward hot path)."""
    (w1, b1), (w2, b2) = conv_params
    (fw1, fb1), (fw2, fb2), (fw3, fb3) = fc_params

    # conv weights -> block-diagonal over the 4 pooling phases, bf16 operands for the MXU
    w1m = w1.reshape(C1, K1)
    w1p = jnp.pad(w1m, ((0, CP1 - C1), (0, 0)))                     # (8, 50), zero rows
    w1blk = _block_diag(w1p, 4).astype(jnp.bfloat16)                # (32, 200)
    b1blk = jnp.tile(jnp.pad(b1, (0, CP1 - C1)), 4).reshape(4 * CP1, 1)

    w2m = w2.reshape(C2, K2)
    w2blk = _block_diag(w2m, 4).astype(jnp.bfloat16)                # (32, 400)
    b2blk = jnp.tile(b2, 4).reshape(4 * CP2, 1)

    # fc1 columns are (c2, i, j) in torch's NCHW flatten; regroup per spatial slot
    # s = i*PW2 + j so the kernel can consume the (C2, s*N + n) pooled layout directly.
    w1fk = jnp.transpose(fw1.reshape(F1, C2, NSLOTS), (2, 0, 1))    # (9, F1, C2)

    return dict(
        w1blk=w1blk, b1blk=b1blk,
        w2blk=w2blk, b2blk=b2blk,
        w1fk=w1fk, b1f=fb1.reshape(F1, 1),
        w2f=fw2, b2f=fb2.reshape(F2, 1),
        w3f=fw3, b3f=fb3.reshape(NCLASSES, 1),
    )


@jax.jit
def convnet_forward(x_nchw, params):
    n = x_nchw.shape[0]
    lanes1 = PH1 * PW1 * n
    lanes2 = NSLOTS * n
    L1 = _round_up(lanes1, 128)                                     # lane-dense stores
    L2 = _round_up(lanes2, 128)

    cparams = pltpu.CompilerParams(vmem_limit_bytes=32 * 1024 * 1024)

    # ---- conv block 1 : one fused pallas_call (conv + bias + ReLU + avgpool) ----
    x_chwn = jnp.transpose(x_nchw, (1, 2, 3, 0))                    # (C0, H, W, N)
    p1 = _pool_phase_patches(x_chwn, K, PH1, PW1)                   # (4, 50, lanes1)
    p1s = p1.reshape(4 * K1, lanes1)                                # phases stacked along K
    p1s = jnp.pad(p1s, ((0, 0), (0, L1 - lanes1))).astype(jnp.bfloat16)

    cost1 = pl.CostEstimate(
        flops=2 * (4 * CP1) * (4 * K1) * L1 + 8 * (4 * CP1) * L1,
        transcendentals=0,
        bytes_accessed=(4 * K1 * L1 + 4 * CP1 * 4 * K1 + C1 * L1) * 2 + 4 * CP1 * 4)

    z1 = pl.pallas_call(
        conv_block1_kernel,
        out_shape=jax.ShapeDtypeStruct((C1, L1), jnp.bfloat16),
        in_specs=[_vmem()] * 3,
        out_specs=_vmem(),
        compiler_params=cparams,
        cost_estimate=cost1,
    )(p1s, params["w1blk"], params["b1blk"])

    # ---- conv block 2 + FC head : one fused pallas_call ----
    z1v = z1[:, :lanes1].reshape(C1, PH1, PW1, n)                   # (i, j, n) lane order kept
    p2 = _pool_phase_patches(z1v, K, PH2, PW2)                      # (4, 100, lanes2) bf16
    p2s = p2.reshape(4 * K2, lanes2)
    p2s = jnp.pad(p2s, ((0, 0), (0, L2 - lanes2)))

    cost2 = pl.CostEstimate(
        flops=(2 * (4 * CP2) * (4 * K2) * L2 + 8 * (4 * CP2) * L2
               + 2 * NSLOTS * F1 * C2 * n + 2 * F2 * F1 * n + 2 * NCLASSES * F2 * n),
        transcendentals=0,
        bytes_accessed=((4 * K2 * L2 + 4 * CP2 * 4 * K2) * 2
                        + (NSLOTS * F1 * C2 + F2 * F1 + NCLASSES * F2
                           + F1 + F2 + NCLASSES + 4 * CP2 + NCLASSES * n) * 4))

    logits_t = pl.pallas_call(
        conv_block2_mlp_kernel,
        out_shape=jax.ShapeDtypeStruct((NCLASSES, n), jnp.float32),
        in_specs=[_vmem()] * 9,
        out_specs=_vmem(),
        compiler_params=cparams,
        cost_estimate=cost2,
    )(p2s, params["w2blk"], params["b2blk"], params["w1fk"], params["b1f"],
      params["w2f"], params["b2f"], params["w3f"], params["b3f"])

    return logits_t.T                                               # (N, NCLASSES)


# ------------------------ pure-JAX reference (checking) ------------------------

def _reference_forward(x, conv_params, fc_params):
    r = x
    for (w, b) in conv_params:
        r = jax.lax.conv_general_dilated(
            r, w, window_strides=(1, 1), padding="VALID",
            dimension_numbers=("NCHW", "OIHW", "NCHW"))
        r = jnp.maximum(r + b[None, :, None, None], 0.0)
        n_, c_, h_, w_ = r.shape
        r = r.reshape(n_, c_, h_ // 2, 2, w_ // 2, 2).mean(axis=(3, 5))
    r = r.reshape(r.shape[0], -1)
    (fw1, fb1), (fw2, fb2), (fw3, fb3) = fc_params
    r = jnp.maximum(r @ fw1.T + fb1, 0.0)
    r = jnp.maximum(r @ fw2.T + fb2, 0.0)
    return r @ fw3.T + fb3


# ------------------------ deterministic parameter init ------------------------

def init_params(key):
    conv_params = []
    in_ch = INPUT_CHANNELS
    for oc in OUT_CHANNELS:
        key, kw_, kb = jax.random.split(key, 3)
        fan_in = in_ch * K * K
        bound = 1.0 / np.sqrt(fan_in)
        w = jax.random.uniform(kw_, (oc, in_ch, K, K), jnp.float32, -bound, bound)
        b = jax.random.uniform(kb, (oc,), jnp.float32, -bound, bound)
        conv_params.append((w, b))
        in_ch = oc

    hh, ww = out_res(len(OUT_CHANNELS), H, W)
    out_conv_size = hh * ww * OUT_CHANNELS[-1]
    fc_sizes = [out_conv_size] + OUT_CONNECTED + [NCLASSES]
    fc_params = []
    for fin, fout in zip(fc_sizes[:-1], fc_sizes[1:]):
        key, kw_, kb = jax.random.split(key, 3)
        bound = 1.0 / np.sqrt(fin)
        w = jax.random.uniform(kw_, (fout, fin), jnp.float32, -bound, bound)
        b = jax.random.uniform(kb, (fout,), jnp.float32, -bound, bound)
        fc_params.append((w, b))
    return conv_params, fc_params


if __name__ == "__main__":
    key = jax.random.PRNGKey(0)
    key, kx = jax.random.split(key)
    x = jax.random.normal(kx, (2, INPUT_CHANNELS, H, W), jnp.float32)   # NCHW, like PyTorch
    conv_params, fc_params = init_params(key)
    params = prepare_params(conv_params, fc_params)                     # one-time re-layout

    out = convnet_forward(x, params)
    out = jax.block_until_ready(out)
    assert out.shape == (2, NCLASSES), out.shape
    assert bool(jnp.all(jnp.isfinite(out)))

    # correctness vs a pure-JAX f32 reference of the PyTorch module
    # (tolerance sized for the bf16-operand / f32-accumulate path)
    ref = _reference_forward(x, conv_params, fc_params)
    np.testing.assert_allclose(np.asarray(out), np.asarray(ref), rtol=3e-2, atol=2e-2)

    print("KERNEL_OK")
</pallas_src>

<mosaic_0001>
module attributes {stable_mosaic.version = 11 : i64} {
  func.func @conv_block1_kernel(%arg0: memref<200x256xbf16, #tpu.memory_space<vmem>>, %arg1: memref<32x200xbf16, #tpu.memory_space<vmem>>, %arg2: memref<32x1xf32, #tpu.memory_space<vmem>>, %arg3: memref<4x256xbf16, #tpu.memory_space<vmem>>) attributes {dimension_semantics = [], scalar_prefetch = 0 : i64, scratch_operands = 0 : i64, tpu.core_type = #tpu.core_type<tc>} {
    %c0 = arith.constant 0 : index
    %c0_0 = arith.constant 0 : index
    %0 = vector.load %arg1[%c0, %c0_0] : memref<32x200xbf16, #tpu.memory_space<vmem>>, vector<32x200xbf16>
    %c0_1 = arith.constant 0 : index
    %c0_2 = arith.constant 0 : index
    %1 = vector.load %arg0[%c0_1, %c0_2] : memref<200x256xbf16, #tpu.memory_space<vmem>>, vector<200x256xbf16>
    %cst = arith.constant dense<0.000000e+00> : vector<32x256xf32>
    %2 = tpu.matmul %0, %1, %cst {dimension_numbers = #tpu.dot_dimension_numbers<[1], [0], [0], [1], [0, 0, 1, 1], [], []>} : vector<32x200xbf16>, vector<200x256xbf16>, vector<32x256xf32> -> vector<32x256xf32>
    %c0_3 = arith.constant 0 : index
    %c0_4 = arith.constant 0 : index
    %3 = vector.load %arg2[%c0_3, %c0_4] : memref<32x1xf32, #tpu.memory_space<vmem>>, vector<32x1xf32>
    %4 = vector.broadcast %3 : vector<32x1xf32> to vector<32x256xf32>
    %5 = arith.addf %2, %4 : vector<32x256xf32>
    %cst_5 = arith.constant 0.000000e+00 : f32
    %6 = vector.broadcast %cst_5 : f32 to vector<32x256xf32>
    %7 = arith.maximumf %5, %6 : vector<32x256xf32>
    %8 = vector.extract_strided_slice %7 {offsets = [0, 0], sizes = [8, 256], strides = [1, 1]} : vector<32x256xf32> to vector<8x256xf32>
    %9 = vector.extract_strided_slice %7 {offsets = [8, 0], sizes = [8, 256], strides = [1, 1]} : vector<32x256xf32> to vector<8x256xf32>
    %10 = arith.addf %8, %9 : vector<8x256xf32>
    %11 = vector.extract_strided_slice %7 {offsets = [16, 0], sizes = [8, 256], strides = [1, 1]} : vector<32x256xf32> to vector<8x256xf32>
    %12 = arith.addf %10, %11 : vector<8x256xf32>
    %13 = vector.extract_strided_slice %7 {offsets = [24, 0], sizes = [8, 256], strides = [1, 1]} : vector<32x256xf32> to vector<8x256xf32>
    %14 = arith.addf %12, %13 : vector<8x256xf32>
    %cst_6 = arith.constant 2.500000e-01 : f32
    %15 = vector.broadcast %cst_6 : f32 to vector<8x256xf32>
    %16 = arith.mulf %15, %14 : vector<8x256xf32>
    %17 = vector.extract_strided_slice %16 {offsets = [0, 0], sizes = [4, 256], strides = [1, 1]} : vector<8x256xf32> to vector<4x256xf32>
    %18 = arith.truncf %17 : vector<4x256xf32> to vector<4x256xbf16>
    %c0_7 = arith.constant 0 : index
    %c0_8 = arith.constant 0 : index
    %19 = vector.load %arg3[%c0_7, %c0_8] : memref<4x256xbf16, #tpu.memory_space<vmem>>, vector<4x256xbf16>
    tpu.vector_store %arg3[%c0_7, %c0_8], %18 {strides = array<i32>} : memref<4x256xbf16, #tpu.memory_space<vmem>>, vector<4x256xbf16>,
    return
  }
}

module attributes {stable_mosaic.version = 11 : i64} {
  func.func @conv_block2_mlp_kernel(%arg0: memref<400x128xbf16, #tpu.memory_space<vmem>>, %arg1: memref<32x400xbf16, #tpu.memory_space<vmem>>, %arg2: memref<32x1xf32, #tpu.memory_space<vmem>>, %arg3: memref<9x32x8xf32, #tpu.memory_space<vmem>>, %arg4: memref<32x1xf32, #tpu.memory_space<vmem>>, %arg5: memref<16x32xf32, #tpu.memory_space<vmem>>, %arg6: memref<16x1xf32, #tpu.memory_space<vmem>>, %arg7: memref<3x16xf32, #tpu.memory_space<vmem>>, %arg8: memref<3x1xf32, #tpu.memory_space<vmem>>, %arg9: memref<3x2xf32, #tpu.memory_space<vmem>>) attributes {dimension_semantics = [], scalar_prefetch = 0 : i64, scratch_operands = 0 : i64, tpu.core_type = #tpu.core_type<tc>} {
    %c0 = arith.constant 0 : index
    %c0_0 = arith.constant 0 : index
    %0 = vector.load %arg1[%c0, %c0_0] : memref<32x400xbf16, #tpu.memory_space<vmem>>, vector<32x400xbf16>
    %c0_1 = arith.constant 0 : index
    %c0_2 = arith.constant 0 : index
    %1 = vector.load %arg0[%c0_1, %c0_2] : memref<400x128xbf16, #tpu.memory_space<vmem>>, vector<400x128xbf16>
    %cst = arith.constant dense<0.000000e+00> : vector<32x128xf32>
    %2 = tpu.matmul %0, %1, %cst {dimension_numbers = #tpu.dot_dimension_numbers<[1], [0], [0], [1], [0, 0, 1, 1], [], []>} : vector<32x400xbf16>, vector<400x128xbf16>, vector<32x128xf32> -> vector<32x128xf32>
    %c0_3 = arith.constant 0 : index
    %c0_4 = arith.constant 0 : index
    %3 = vector.load %arg2[%c0_3, %c0_4] : memref<32x1xf32, #tpu.memory_space<vmem>>, vector<32x1xf32>
    %4 = vector.broadcast %3 : vector<32x1xf32> to vector<32x128xf32>
    %5 = arith.addf %2, %4 : vector<32x128xf32>
    %cst_5 = arith.constant 0.000000e+00 : f32
    %6 = vector.broadcast %cst_5 : f32 to vector<32x128xf32>
    %7 = arith.maximumf %5, %6 : vector<32x128xf32>
    %8 = vector.extract_strided_slice %7 {offsets = [0, 0], sizes = [8, 128], strides = [1, 1]} : vector<32x128xf32> to vector<8x128xf32>
    %9 = vector.extract_strided_slice %7 {offsets = [8, 0], sizes = [8, 128], strides = [1, 1]} : vector<32x128xf32> to vector<8x128xf32>
    %10 = arith.addf %8, %9 : vector<8x128xf32>
    %11 = vector.extract_strided_slice %7 {offsets = [16, 0], sizes = [8, 128], strides = [1, 1]} : vector<32x128xf32> to vector<8x128xf32>
    %12 = arith.addf %10, %11 : vector<8x128xf32>
    %13 = vector.extract_strided_slice %7 {offsets = [24, 0], sizes = [8, 128], strides = [1, 1]} : vector<32x128xf32> to vector<8x128xf32>
    %14 = arith.addf %12, %13 : vector<8x128xf32>
    %cst_6 = arith.constant 2.500000e-01 : f32
    %15 = vector.broadcast %cst_6 : f32 to vector<8x128xf32>
    %16 = arith.mulf %15, %14 : vector<8x128xf32>
    %c0_7 = arith.constant 0 : index
    %c0_8 = arith.constant 0 : index
    %c0_9 = arith.constant 0 : index
    %17 = vector.load %arg3[%c0_7, %c0_8, %c0_9] : memref<9x32x8xf32, #tpu.memory_space<vmem>>, vector<1x32x8xf32>
    %18 = vector.shape_cast %17 : vector<1x32x8xf32> to vector<32x8xf32>
    %19 = vector.extract_strided_slice %16 {offsets = [0, 0], sizes = [8, 2], strides = [1, 1]} : vector<8x128xf32> to vector<8x2xf32>
    %cst_10 = arith.constant dense<0.000000e+00> : vector<32x2xf32>
    %20 = tpu.matmul %18, %19, %cst_10 {dimension_numbers = #tpu.dot_dimension_numbers<[1], [0], [0], [1], [0, 0, 1, 1], [], []>} : vector<32x8xf32>, vector<8x2xf32>, vector<32x2xf32> -> vector<32x2xf32>
    %c1 = arith.constant 1 : index
    %c0_11 = arith.constant 0 : index
    %c0_12 = arith.constant 0 : index
    %21 = vector.load %arg3[%c1, %c0_11, %c0_12] : memref<9x32x8xf32, #tpu.memory_space<vmem>>, vector<1x32x8xf32>
    %22 = vector.shape_cast %21 : vector<1x32x8xf32> to vector<32x8xf32>
    %23 = vector.extract_strided_slice %16 {offsets = [0, 2], sizes = [8, 2], strides = [1, 1]} : vector<8x128xf32> to vector<8x2xf32>
    %cst_13 = arith.constant dense<0.000000e+00> : vector<32x2xf32>
    %24 = tpu.matmul %22, %23, %cst_13 {dimension_numbers = #tpu.dot_dimension_numbers<[1], [0], [0], [1], [0, 0, 1, 1], [], []>} : vector<32x8xf32>, vector<8x2xf32>, vector<32x2xf32> -> vector<32x2xf32>
    %25 = arith.addf %20, %24 : vector<32x2xf32>
    %c2 = arith.constant 2 : index
    %c0_14 = arith.constant 0 : index
    %c0_15 = arith.constant 0 : index
    %26 = vector.load %arg3[%c2, %c0_14, %c0_15] : memref<9x32x8xf32, #tpu.memory_space<vmem>>, vector<1x32x8xf32>
    %27 = vector.shape_cast %26 : vector<1x32x8xf32> to vector<32x8xf32>
    %28 = vector.extract_strided_slice %16 {offsets = [0, 4], sizes = [8, 2], strides = [1, 1]} : vector<8x128xf32> to vector<8x2xf32>
    %cst_16 = arith.constant dense<0.000000e+00> : vector<32x2xf32>
    %29 = tpu.matmul %27, %28, %cst_16 {dimension_numbers = #tpu.dot_dimension_numbers<[1], [0], [0], [1], [0, 0, 1, 1], [], []>} : vector<32x8xf32>, vector<8x2xf32>, vector<32x2xf32> -> vector<32x2xf32>
    %30 = arith.addf %25, %29 : vector<32x2xf32>
    %c3 = arith.constant 3 : index
    %c0_17 = arith.constant 0 : index
    %c0_18 = arith.constant 0 : index
    %31 = vector.load %arg3[%c3, %c0_17, %c0_18] : memref<9x32x8xf32, #tpu.memory_space<vmem>>, vector<1x32x8xf32>
    %32 = vector.shape_cast %31 : vector<1x32x8xf32> to vector<32x8xf32>
    %33 = vector.extract_strided_slice %16 {offsets = [0, 6], sizes = [8, 2], strides = [1, 1]} : vector<8x128xf32> to vector<8x2xf32>
    %cst_19 = arith.constant dense<0.000000e+00> : vector<32x2xf32>
    %34 = tpu.matmul %32, %33, %cst_19 {dimension_numbers = #tpu.dot_dimension_numbers<[1], [0], [0], [1], [0, 0, 1, 1], [], []>} : vector<32x8xf32>, vector<8x2xf32>, vector<32x2xf32> -> vector<32x2xf32>
    %35 = arith.addf %30, %34 : vector<32x2xf32>
    %c4 = arith.constant 4 : index
    %c0_20 = arith.constant 0 : index
    %c0_21 = arith.constant 0 : index
    %36 = vector.load %arg3[%c4, %c0_20, %c0_21] : memref<9x32x8xf32, #tpu.memory_space<vmem>>, vector<1x32x8xf32>
    %37 = vector.shape_cast %36 : vector<1x32x8xf32> to vector<32x8xf32>
    %38 = vector.extract_strided_slice %16 {offsets = [0, 8], sizes = [8, 2], strides = [1, 1]} : vector<8x128xf32> to vector<8x2xf32>
    %cst_22 = arith.constant dense<0.000000e+00> : vector<32x2xf32>
    %39 = tpu.matmul %37, %38, %cst_22 {dimension_numbers = #tpu.dot_dimension_numbers<[1], [0], [0], [1], [0, 0, 1, 1], [], []>} : vector<32x8xf32>, vector<8x2xf32>, vector<32x2xf32> -> vector<32x2xf32>
    %40 = arith.addf %35, %39 : vector<32x2xf32>
    %c5 = arith.constant 5 : index
    %c0_23 = arith.constant 0 : index
    %c0_24 = arith.constant 0 : index
    %41 = vector.load %arg3[%c5, %c0_23, %c0_24] : memref<9x32x8xf32, #tpu.memory_space<vmem>>, vector<1x32x8xf32>
    %42 = vector.shape_cast %41 : vector<1x32x8xf32> to vector<32x8xf32>
    %43 = vector.extract_strided_slice %16 {offsets = [0, 10], sizes = [8, 2], strides = [1, 1]} : vector<8x128xf32> to vector<8x2xf32>
    %cst_25 = arith.constant dense<0.000000e+00> : vector<32x2xf32>
    %44 = tpu.matmul %42, %43, %cst_25 {dimension_numbers = #tpu.dot_dimension_numbers<[1], [0], [0], [1], [0, 0, 1, 1], [], []>} : vector<32x8xf32>, vector<8x2xf32>, vector<32x2xf32> -> vector<32x2xf32>
    %45 = arith.addf %40, %44 : vector<32x2xf32>
    %c6 = arith.constant 6 : index
    %c0_26 = arith.constant 0 : index
    %c0_27 = arith.constant 0 : index
    %46 = vector.load %arg3[%c6, %c0_26, %c0_27] : memref<9x32x8xf32, #tpu.memory_space<vmem>>, vector<1x32x8xf32>
    %47 = vector.shape_cast %46 : vector<1x32x8xf32> to vector<32x8xf32>
    %48 = vector.extract_strided_slice %16 {offsets = [0, 12], sizes = [8, 2], strides = [1, 1]} : vector<8x128xf32> to vector<8x2xf32>
    %cst_28 = arith.constant dense<0.000000e+00> : vector<32x2xf32>
    %49 = tpu.matmul %47, %48, %cst_28 {dimension_numbers = #tpu.dot_dimension_numbers<[1], [0], [0], [1], [0, 0, 1, 1], [], []>} : vector<32x8xf32>, vector<8x2xf32>, vector<32x2xf32> -> vector<32x2xf32>
    %50 = arith.addf %45, %49 : vector<32x2xf32>
    %c7 = arith.constant 7 : index
    %c0_29 = arith.constant 0 : index
    %c0_30 = arith.constant 0 : index
    %51 = vector.load %arg3[%c7, %c0_29, %c0_30] : memref<9x32x8xf32, #tpu.memory_space<vmem>>, vector<1x32x8xf32>
    %52 = vector.shape_cast %51 : vector<1x32x8xf32> to vector<32x8xf32>
    %53 = vector.extract_strided_slice %16 {offsets = [0, 14], sizes = [8, 2], strides = [1, 1]} : vector<8x128xf32> to vector<8x2xf32>
    %cst_31 = arith.constant dense<0.000000e+00> : vector<32x2xf32>
    %54 = tpu.matmul %52, %53, %cst_31 {dimension_numbers = #tpu.dot_dimension_numbers<[1], [0], [0], [1], [0, 0, 1, 1], [], []>} : vector<32x8xf32>, vector<8x2xf32>, vector<32x2xf32> -> vector<32x2xf32>
    %55 = arith.addf %50, %54 : vector<32x2xf32>
    %c8 = arith.constant 8 : index
    %c0_32 = arith.constant 0 : index
    %c0_33 = arith.constant 0 : index
    %56 = vector.load %arg3[%c8, %c0_32, %c0_33] : memref<9x32x8xf32, #tpu.memory_space<vmem>>, vector<1x32x8xf32>
    %57 = vector.shape_cast %56 : vector<1x32x8xf32> to vector<32x8xf32>
    %58 = vector.extract_strided_slice %16 {offsets = [0, 16], sizes = [8, 2], strides = [1, 1]} : vector<8x128xf32> to vector<8x2xf32>
    %cst_34 = arith.constant dense<0.000000e+00> : vector<32x2xf32>
    %59 = tpu.matmul %57, %58, %cst_34 {dimension_numbers = #tpu.dot_dimension_numbers<[1], [0], [0], [1], [0, 0, 1, 1], [], []>} : vector<32x8xf32>, vector<8x2xf32>, vector<32x2xf32> -> vector<32x2xf32>
    %60 = arith.addf %55, %59 : vector<32x2xf32>
    %c0_35 = arith.constant 0 : index
    %c0_36 = arith.constant 0 : index
    %61 = vector.load %arg4[%c0_35, %c0_36] : memref<32x1xf32, #tpu.memory_space<vmem>>, vector<32x1xf32>
    %62 = vector.broadcast %61 : vector<32x1xf32> to vector<32x2xf32>
    %63 = arith.addf %60, %62 : vector<32x2xf32>
    %cst_37 = arith.constant 0.000000e+00 : f32
    %64 = vector.broadcast %cst_37 : f32 to vector<32x2xf32>
    %65 = arith.maximumf %63, %64 : vector<32x2xf32>
    %c0_38 = arith.constant 0 : index
    %c0_39 = arith.constant 0 : index
    %66 = vector.load %arg5[%c0_38, %c0_39] : memref<16x32xf32, #tpu.memory_space<vmem>>, vector<16x32xf32>
    %cst_40 = arith.constant dense<0.000000e+00> : vector<16x2xf32>
    %67 = tpu.matmul %66, %65, %cst_40 {dimension_numbers = #tpu.dot_dimension_numbers<[1], [0], [0], [1], [0, 0, 1, 1], [], []>} : vector<16x32xf32>, vector<32x2xf32>, vector<16x2xf32> -> vector<16x2xf32>
    %c0_41 = arith.constant 0 : index
    %c0_42 = arith.constant 0 : index
    %68 = vector.load %arg6[%c0_41, %c0_42] : memref<16x1xf32, #tpu.memory_space<vmem>>, vector<16x1xf32>
    %69 = vector.broadcast %68 : vector<16x1xf32> to vector<16x2xf32>
    %70 = arith.addf %67, %69 : vector<16x2xf32>
    %cst_43 = arith.constant 0.000000e+00 : f32
    %71 = vector.broadcast %cst_43 : f32 to vector<16x2xf32>
    %72 = arith.maximumf %70, %71 : vector<16x2xf32>
    %c0_44 = arith.constant 0 : index
    %c0_45 = arith.constant 0 : index
    %73 = vector.load %arg7[%c0_44, %c0_45] : memref<3x16xf32, #tpu.memory_space<vmem>>, vector<3x16xf32>
    %cst_46 = arith.constant dense<0.000000e+00> : vector<3x2xf32>
    %74 = tpu.matmul %73, %72, %cst_46 {dimension_numbers = #tpu.dot_dimension_numbers<[1], [0], [0], [1], [0, 0, 1, 1], [], []>} : vector<3x16xf32>, vector<16x2xf32>, vector<3x2xf32> -> vector<3x2xf32>
    %c0_47 = arith.constant 0 : index
    %c0_48 = arith.constant 0 : index
    %75 = vector.load %arg8[%c0_47, %c0_48] : memref<3x1xf32, #tpu.memory_space<vmem>>, vector<3x1xf32>
    %76 = vector.broadcast %75 : vector<3x1xf32> to vector<3x2xf32>
    %77 = arith.addf %74, %76 : vector<3x2xf32>
    %c0_49 = arith.constant 0 : index
    %c0_50 = arith.constant 0 : index
    %78 = vector.load %arg9[%c0_49, %c0_50] : memref<3x2xf32, #tpu.memory_space<vmem>>, vector<3x2xf32>
    tpu.vector_store %arg9[%c0_49, %c0_50], %77 {strides = array<i32>} : memref<3x2xf32, #tpu.memory_space<vmem>>, vector<3x2xf32>,
    return
  }
}

</mosaic_0001>

<bundles_post_ra>
// kernel: convnet_forward.2
= control target key start
LH: loop header
LB: loop body
LE: loop exit
PB: predicated region body
PF: predicated region fallthrough
CT: control target
= control target key end

     0   :  { %v420_v1 = vmov 0   ;;  %vm211_vm0 = vcmask 588800   ;;  %vm218_vm1 = vcmask 1043456   ;;  %s543_s0 = inlined_call_operand.vmem [shape: bf16[200,256], index: 0, kind: input, shape index: {}]   ;;  %s544_s1 = inlined_call_operand.vmem [shape: bf16[32,200], index: 1, kind: input, shape index: {}]   ;;  %s545_s2 = inlined_call_operand.vmem [shape: f32[32,1], index: 2, kind: input, shape index: {}]   ;;  %s546_s3 = inlined_call_operand.vmem [shape: bf16[4,256], index: 3, kind: output, shape index: {}]  }
   0x1   :  { %v376_v0 = vld [vmem:[%s543_s0 + $0x4] ss:$8 sps:$4 sm:$0xff]   ;;  %374 = vset.pattern.permute.xlu0 %v420_v1  ;;  %375 = vset.pattern.permute.xlu1 %v420_v1  ;;  %v378_v2 = vld [vmem:[%s543_s0] ss:$8 sps:$4 sm:$0xff]   ;;  %v379_v3 = vld [vmem:[%s543_s0 + $0x14] ss:$8 sps:$4 sm:$0xff]  }
   0x2   :  { %225 = vmatprep.subr.bf16.mxu0 %v376_v0  ;;  %347 = vmatprep.subr.bf16.mxu1 %v376_v0  ;;  %v381_v4 = vld [vmem:[%s543_s0 + $0x10] ss:$8 sps:$4 sm:$0xff]   ;;  %v382_v5 = vld [vmem:[%s543_s0 + $0x24] ss:$8 sps:$4 sm:$0xff]   ;;  %v384_v6 = vld [vmem:[%s543_s0 + $0x20] ss:$8 sps:$4 sm:$0xff]  }
   0x3   :  { %226 = vmatpush1.bf16.msra.mxu0 %v378_v2  ;;  %360 = vmatpush1.bf16.msra.mxu1 %v378_v2  ;;  %v385_v7 = vld [vmem:[%s543_s0 + $0x34] ss:$8 sps:$4 sm:$0xff]   ;;  %v387_v8 = vld [vmem:[%s543_s0 + $0x30] ss:$8 sps:$4 sm:$0xff]   ;;  %v388_v9 = vld [vmem:[%s543_s0 + $0x44] ss:$8 sps:$4 sm:$0xff]  }
   0x4   :  { %227 = vmatprep.subr.bf16.mxu0 %v379_v3  ;;  %348 = vmatprep.subr.bf16.mxu1 %v379_v3  ;;  %v390_v10 = vld [vmem:[%s543_s0 + $0x40] ss:$8 sps:$4 sm:$0xff]   ;;  %v391_v11 = vld [vmem:[%s543_s0 + $0x54] ss:$8 sps:$4 sm:$0xff]   ;;  %v416_v12 = vld [vmem:[%s544_s1 + $0x4] ss:$8 sps:$4 sm:$0xff]  }
   0x5   :  { %v419_v13 = vld [vmem:[%s544_s1 + $0x14] ss:$8 sps:$4 sm:$0xff]   ;;  %v393_v14 = vld [vmem:[%s543_s0 + $0x50] ss:$8 sps:$4 sm:$0xff]   ;;  %v44_v15 = vld [vmem:[%s545_s2] sm:$0xff]  ;;  %343 = vmatprep.mubr.msk.bf16.mxu0 %vm211_vm0, %v416_v12 }
   0x6   :  { %v46_v16 = vld [vmem:[%s545_s2 + $0x10] sm:$0xff]  ;;  %v394_v17 = vld [vmem:[%s543_s0 + $0x64] ss:$8 sps:$4 sm:$0xff]   ;;  %344 = vmatprep.mubr.msk.bf16.mxu1 %vm211_vm0, %v419_v13  ;;  %50 = vperm.xlu0 %374, %v44_v15   ;;  %v396_v18 = vld [vmem:[%s543_s0 + $0x60] ss:$8 sps:$4 sm:$0xff]  }
   0x7   :  { %228 = vmatpush1.bf16.msra.mxu0 %v381_v4  ;;  %361 = vmatpush1.bf16.msra.mxu1 %v381_v4  ;;  %v45_v19 = vld [vmem:[%s545_s2 + $0x8] sm:$0xff]  ;;  %v47_v20 = vld [vmem:[%s545_s2 + $0x18] sm:$0xff]  ;;  %v43_v30 = vld [vmem:[%s543_s0 + $0xc0] sm:$0xff] }
   0x8   :  { %229 = vmatprep.subr.bf16.mxu0 %v382_v5  ;;  %349 = vmatprep.subr.bf16.mxu1 %v382_v5  ;;  %v397_v21 = vld [vmem:[%s543_s0 + $0x74] ss:$8 sps:$4 sm:$0xff]   ;;  %v399_v22 = vld [vmem:[%s543_s0 + $0x70] ss:$8 sps:$4 sm:$0xff]   ;;  %v400_v23 = vld [vmem:[%s543_s0 + $0x84] ss:$8 sps:$4 sm:$0xff]   ;;  %v341_v32 = vcombine.high %v43_v30, %v43_v30  ;;  %v340_v33 = vcombine.low %v43_v30, %v43_v30 }
   0x9   :  { %60 = vperm.xlu1 %375, %v46_v16   ;;  %v402_v24 = vld [vmem:[%s543_s0 + $0x80] ss:$8 sps:$4 sm:$0xff]   ;;  %v403_v25 = vld [vmem:[%s543_s0 + $0x94] ss:$8 sps:$4 sm:$0xff]   ;;  %v405_v26 = vld [vmem:[%s543_s0 + $0x90] ss:$8 sps:$4 sm:$0xff]  }
   0xa   :  { %55 = vperm.xlu0 %374, %v45_v19   ;;  %v406_v27 = vld [vmem:[%s543_s0 + $0xa4] ss:$8 sps:$4 sm:$0xff]   ;;  %v408_v28 = vld [vmem:[%s543_s0 + $0xa0] ss:$8 sps:$4 sm:$0xff]   ;;  %v409_v29 = vld [vmem:[%s543_s0 + $0xb4] ss:$8 sps:$4 sm:$0xff]  }
   0xb   :  { %230 = vmatpush1.bf16.msra.mxu0 %v384_v6  ;;  %362 = vmatpush1.bf16.msra.mxu1 %v384_v6  ;;  %v411_v31 = vld [vmem:[%s543_s0 + $0xb0] ss:$8 sps:$4 sm:$0xff]   ;;  %v220_v34 = vsel %vm218_vm1, %v340_v33, 0  ;;  %v414_v35 = vld [vmem:[%s544_s1] ss:$8 sps:$4 sm:$0xff]  }
   0xc   :  { %231 = vmatprep.subr.bf16.mxu0 %v385_v7  ;;  %350 = vmatprep.subr.bf16.mxu1 %v385_v7  ;;  %v417_v36 = vld [vmem:[%s544_s1 + $0x10] ss:$8 sps:$4 sm:$0xff]  }
   0xd   :  { %65 = vperm.xlu1 %375, %v47_v20  }
   0xf   :  { %232 = vmatpush1.bf16.msra.mxu0 %v387_v8  ;;  %363 = vmatpush1.bf16.msra.mxu1 %v387_v8 }
  0x10   :  { %233 = vmatprep.subr.bf16.mxu0 %v388_v9  ;;  %351 = vmatprep.subr.bf16.mxu1 %v388_v9 }
  0x13   :  { %234 = vmatpush1.bf16.msra.mxu0 %v390_v10  ;;  %364 = vmatpush1.bf16.msra.mxu1 %v390_v10 }
  0x14   :  { %235 = vmatprep.subr.bf16.mxu0 %v391_v11  ;;  %352 = vmatprep.subr.bf16.mxu1 %v391_v11 }
  0x17   :  { %236 = vmatpush1.bf16.msra.mxu0 %v393_v14  ;;  %365 = vmatpush1.bf16.msra.mxu1 %v393_v14 }
  0x18   :  { %237 = vmatprep.subr.bf16.mxu0 %v394_v17  ;;  %353 = vmatprep.subr.bf16.mxu1 %v394_v17 }
  0x1b   :  { %238 = vmatpush1.bf16.msra.mxu0 %v396_v18  ;;  %366 = vmatpush1.bf16.msra.mxu1 %v396_v18 }
  0x1c   :  { %239 = vmatprep.subr.bf16.mxu0 %v397_v21  ;;  %354 = vmatprep.subr.bf16.mxu1 %v397_v21 }
  0x1f   :  { %240 = vmatpush1.bf16.msra.mxu0 %v399_v22  ;;  %367 = vmatpush1.bf16.msra.mxu1 %v399_v22 }
  0x20   :  { %241 = vmatprep.subr.bf16.mxu0 %v400_v23  ;;  %355 = vmatprep.subr.bf16.mxu1 %v400_v23 }
  0x23   :  { %242 = vmatpush1.bf16.msra.mxu0 %v402_v24  ;;  %368 = vmatpush1.bf16.msra.mxu1 %v402_v24 }
  0x24   :  { %243 = vmatprep.subr.bf16.mxu0 %v403_v25  ;;  %356 = vmatprep.subr.bf16.mxu1 %v403_v25 }
  0x27   :  { %244 = vmatpush1.bf16.msra.mxu0 %v405_v26  ;;  %369 = vmatpush1.bf16.msra.mxu1 %v405_v26 }
  0x28   :  { %245 = vmatprep.subr.bf16.mxu0 %v406_v27  ;;  %357 = vmatprep.subr.bf16.mxu1 %v406_v27 }
  0x2b   :  { %246 = vmatpush1.bf16.msra.mxu0 %v408_v28  ;;  %370 = vmatpush1.bf16.msra.mxu1 %v408_v28 }
  0x2c   :  { %247 = vmatprep.subr.bf16.mxu0 %v409_v29  ;;  %358 = vmatprep.subr.bf16.mxu1 %v409_v29 }
  0x2f   :  { %248 = vmatpush1.bf16.msra.mxu0 %v411_v31  ;;  %371 = vmatpush1.bf16.msra.mxu1 %v411_v31 }
  0x30   :  { %342 = vmatprep.subr.msk.bf16.mxu0 %vm218_vm1, %v341_v32  ;;  %359 = vmatprep.subr.msk.bf16.mxu1 %vm218_vm1, %v341_v32 }
  0x33   :  { %250 = vmatpush1.bf16.msra.mxu0 %v220_v34  ;;  %372 = vmatpush1.bf16.msra.mxu1 %v220_v34 }
  0x36   :  { %258 = vmatmul.mubr.bf16.vlgmr.msra.gmra.mrb[0].mxu0 %v414_v35  ;;  %268 = vmatmul.mubr.bf16.vlgmr.msra.gmra.mrb[0].mxu1 %v417_v36 }
  0x85   :  { %v51_v37 = vpop.permute.xlu0 %50 }
  0x88   :  { %v61_v38 = vpop.permute.xlu1 %60 }
  0x89   :  { %v56_v39 = vpop.permute.xlu0 %55 }
  0x8c   :  { %v66_v40 = vpop.permute.xlu1 %65 }
 0x109   :  { %v259_v41 = vpop.f32.mrb[0].mxu0  ;;  %v269_v42 = vpop.f32.mrb[0].mxu1 }
 0x10a   :  { %v260_v43 = vadd.f32 %v259_v41, %v51_v37  ;;  %v270_v44 = vadd.f32 %v269_v42, %v61_v38  ;;  %v261_v45 = vpop.f32.mrb[1].mxu0  ;;  %v271_v46 = vpop.f32.mrb[1].mxu1 }
 0x10b   :  { %v262_v47 = vadd.f32 %v261_v45, %v51_v37  ;;  %v263_v48 = vpop.f32.mrb[2].mxu0  ;;  %v273_v49 = vpop.f32.mrb[2].mxu1  ;;  %v272_v53 = vadd.f32 %v271_v46, %v61_v38 }
 0x10c   :  { %v264_v50 = vadd.f32 %v263_v48, %v56_v39  ;;  %v265_v51 = vpop.f32.mrb[3].mxu0  ;;  %v275_v52 = vpop.f32.mrb[3].mxu1  ;;  %v278_v55 = vmax.f32 %v260_v43, 0.0  ;;  %v282_v56 = vmax.f32 %v270_v44, 0.0  ;;  %v274_v58 = vadd.f32 %v273_v49, %v66_v40 }
 0x10d   :  { %v266_v54 = vadd.f32 %v265_v51, %v56_v39  ;;  %v279_v59 = vmax.f32 %v262_v47, 0.0  ;;  %v276_v61 = vadd.f32 %v275_v52, %v66_v40  ;;  %v283_v63 = vmax.f32 %v272_v53, 0.0 }
 0x10e   :  { %v280_v57 = vmax.f32 %v264_v50, 0.0  ;;  %v284_v1 = vmax.f32 %v274_v58, 0.0 }
 0x10f   :  { %v281_v60 = vmax.f32 %v266_v54, 0.0  ;;  %v285_v3 = vmax.f32 %v276_v61, 0.0 }
 0x110   :  { %v286_v62 = vadd.f32 %v280_v57, %v278_v55 }
 0x111   :  { %v287_v0 = vadd.f32 %v281_v60, %v279_v59 }
 0x112   :  { %v288_v2 = vadd.f32 %v286_v62, %v282_v56 }
 0x113   :  { %v289_v4 = vadd.f32 %v287_v0, %v283_v63 }
 0x114   :  { %v290_v5 = vadd.f32 %v288_v2, %v284_v1 }
 0x115   :  { %v291_v6 = vadd.f32 %v289_v4, %v285_v3 }
 0x116   :  { %v292_v7 = vmul.f32 0.25, %v290_v5 }
 0x117   :  { %v293_v8 = vmul.f32 0.25, %v291_v6 }
 0x119   :  { %v345_v9 = vpack.c.bf16 %v293_v8, %v292_v7 }
 0x11b   :  { %346 = vst.sshfl [vmem:[%s546_s3] sm:$0x33 pattern:$0x76325410] %v345_v9 }

// kernel: convnet_forward.3
= control target key start
LH: loop header
LB: loop body
LE: loop exit
PB: predicated region body
PF: predicated region fallthrough
CT: control target
= control target key end

     0   :  { %v1975_v1 = vmov 0   ;;  %vm303_vm0 = vcmask 130048   ;;  %vm429_vm1 = vcmask 64512   ;;  %s1976_s19 = smov 124   ;;  %s1977_s20 = smov 126   ;;  %vm1433_vm2 = vcmask 261120   ;;  %s2341_s0 = inlined_call_operand.vmem [shape: bf16[400,128], index: 0, kind: input, shape index: {}]   ;;  %s2342_s1 = inlined_call_operand.vmem [shape: bf16[32,400], index: 1, kind: input, shape index: {}]   ;;  %s2343_s2 = inlined_call_operand.vmem [shape: f32[32,1], index: 2, kind: input, shape index: {}]   ;;  %s2344_s3 = inlined_call_operand.vmem [shape: f32[9,32,8], index: 3, kind: input, shape index: {}]   ;;  %s2345_s4 = inlined_call_operand.vmem [shape: f32[32,1], index: 4, kind: input, shape index: {}]   ;;  %s2346_s6 = inlined_call_operand.vmem [shape: f32[16,1], index: 6, kind: input, shape index: {}]   ;;  %s2347_s8 = inlined_call_operand.vmem [shape: f32[3,1], index: 8, kind: input, shape index: {}]   ;;  %s2348_s5 = inlined_call_operand.vmem [shape: f32[16,32], index: 5, kind: input, shape index: {}]   ;;  %s2349_s7 = inlined_call_operand.vmem [shape: f32[3,16], index: 7, kind: input, shape index: {}]   ;;  %s2350_s9 = inlined_call_operand.vmem [shape: f32[3,2], index: 9, kind: output, shape index: {}]  }
   0x1   :  { %v1938_v0 = vld [vmem:[%s2341_s0 + $0x40] sm:$0xff]   ;;  %1936 = vset.pattern.permute.xlu0 %v1975_v1  ;;  %1937 = vset.pattern.permute.xlu1 %v1975_v1  ;;  %v1940_v3 = vld [vmem:[%s2341_s0 + $0x48] sm:$0xff]   ;;  %v1942_v5 = vld [vmem:[%s2341_s0 + $0x50] sm:$0xff]   ;;  %s1979_s21 = smov 122   ;;  %s1980_s22 = smov 116   ;;  %vm1985_vm3 = vmmov 0  }
   0x2   :  { %v1939_v2 = vld [vmem:[%s2341_s0] sm:$0xff]   ;;  %1709 = vmatprep.subr.bf16.mxu1 %v1938_v0  ;;  %v1941_v4 = vld [vmem:[%s2341_s0 + $0x8] sm:$0xff]   ;;  %v1943_v6 = vld [vmem:[%s2341_s0 + $0x10] sm:$0xff]   ;;  %s1981_s23 = smov 118   ;;  %s1982_s24 = smov 112   ;;  %vm1597_vm4 = vcmask 10240  }
   0x3   :  { %1710 = vmatpush3.bf16.msra.mxu1 %v1939_v2  ;;  %v1944_v7 = vld [vmem:[%s2341_s0 + $0x58] sm:$0xff]   ;;  %v1946_v9 = vld [vmem:[%s2341_s0 + $0x60] sm:$0xff]   ;;  %v1948_v11 = vld [vmem:[%s2341_s0 + $0x68] sm:$0xff]   ;;  %s1983_s25 = smov 114  }
   0x4   :  { %1711 = vmatprep.subr.bf16.mxu1 %v1940_v3  ;;  %v1945_v8 = vld [vmem:[%s2341_s0 + $0x18] sm:$0xff]   ;;  %v1947_v10 = vld [vmem:[%s2341_s0 + $0x20] sm:$0xff]   ;;  %v1949_v13 = vld [vmem:[%s2341_s0 + $0x28] sm:$0xff]  }
   0x5   :  { %v1956_v12 = vld [vmem:[%s2342_s1 + $0x4] ss:$16 sps:$4 sm:$0xff]   ;;  %v1952_v16 = vld [vmem:[%s2341_s0 + $0x78] sm:$0xff]   ;;  %v1954_v18 = vld [vmem:[%s2342_s1] ss:$16 sps:$4 sm:$0xff]  }
   0x6   :  { %342 = vmatprep.mubr.bf16.mxu1 %v1956_v12  ;;  %v1950_v14 = vld [vmem:[%s2341_s0 + $0x70] sm:$0xff]   ;;  %v1953_v17 = vld [vmem:[%s2341_s0 + $0x38] sm:$0xff]   ;;  %v91_v19 = vld [vmem:[%s2343_s2] sm:$0xff] }
   0x7   :  { %1712 = vmatpush3.bf16.msra.mxu1 %v1941_v4  ;;  %v1951_v15 = vld [vmem:[%s2341_s0 + $0x30] sm:$0xff]   ;;  %v1957_v20 = vld [vmem:[%s2341_s0 + $0x80] sm:$0xff]   ;;  %97 = vperm.xlu0 %1936, %v91_v19   ;;  %v92_v23 = vld [vmem:[%s2343_s2 + $0x8] sm:$0xff] }
   0x8   :  { %1713 = vmatprep.subr.bf16.mxu1 %v1942_v5  ;;  %v1963_v21 = vld [vmem:[%s2342_s1 + $0x24] ss:$16 sps:$4 sm:$0xff]   ;;  %v94_v24 = vld [vmem:[%s2343_s2 + $0x18] sm:$0xff]  ;;  %v1958_v25 = vld [vmem:[%s2341_s0 + $0x88] sm:$0xff]  }
   0x9   :  { %v93_v22 = vld [vmem:[%s2343_s2 + $0x10] sm:$0xff]  ;;  %v1971_v28 = vld [vmem:[%s2342_s1 + $0xc] ss:$16 sps:$4 sm:$0xff]   ;;  %v1961_v30 = vld [vmem:[%s2341_s0 + $0xa0] sm:$0xff]   ;;  %s1978_s2 = smov 120  }
   0xa   :  { %107 = vperm.xlu1 %1937, %v93_v22   ;;  %v1965_v26 = vld [vmem:[%s2342_s1 + $0x20] ss:$16 sps:$4 sm:$0xff]   ;;  %v1960_v29 = vld [vmem:[%s2341_s0 + $0x98] sm:$0xff]   ;;  %v1962_v31 = vld [vmem:[%s2341_s0 + $0xa8] sm:$0xff]  }
   0xb   :  { %1714 = vmatpush3.bf16.msra.mxu1 %v1943_v6  ;;  %102 = vperm.xlu0 %1936, %v92_v23   ;;  %v1959_v27 = vld [vmem:[%s2341_s0 + $0x90] sm:$0xff]   ;;  %v1967_v33 = vld [vmem:[%s2341_s0 + $0xb8] sm:$0xff]   ;;  %v1968_v34 = vld [vmem:[%s2341_s0 + $0xc0] sm:$0xff]  }
   0xc   :  { %1715 = vmatprep.subr.bf16.mxu1 %v1944_v7  ;;  %v1966_v32 = vld [vmem:[%s2341_s0 + $0xb0] sm:$0xff]   ;;  %v1969_v35 = vld [vmem:[%s2342_s1 + $0x8] ss:$16 sps:$4 sm:$0xff]   ;;  %v1972_v36 = vld [vmem:[%s2342_s1 + $0x2c] ss:$16 sps:$4 sm:$0xff]  }
   0xd   :  { %v1974_v37 = vld [vmem:[%s2342_s1 + $0x28] ss:$16 sps:$4 sm:$0xff]   ;;  %v1638_v0 = vld [vmem:[%s2344_s3 + $0x20] sm:$0xff] }
   0xe   :  { %112 = vperm.xlu1 %1937, %v94_v24   ;;  %1793 = vmatprep.mubr.msk.f32.mxu0 %vm429_vm1, %v1638_v0  ;;  %v1422_v19 = vld [vmem:[%s2346_s6 + $0x8] sm:$0xff]  ;;  %v1640_v24 = vld [vmem:[%s2344_s3 + $0x30] sm:$0xff]  ;;  %v1701_v0 = vld [vmem:[%s2344_s3 + $0x118] sm:$0xff] }
   0xf   :  { %1716 = vmatpush3.bf16.msra.mxu1 %v1945_v8  ;;  %v1639_v23 = vld [vmem:[%s2344_s3 + $0x28] sm:$0xff] }
  0x10   :  { %1717 = vmatprep.subr.bf16.mxu1 %v1946_v9 }
  0x13   :  { %1718 = vmatpush3.bf16.msra.mxu1 %v1947_v10 }
  0x14   :  { %1719 = vmatprep.subr.bf16.mxu1 %v1948_v11 }
  0x17   :  { %1720 = vmatpush3.bf16.msra.mxu1 %v1949_v13 }
  0x18   :  { %1721 = vmatprep.subr.bf16.mxu1 %v1950_v14 }
  0x1b   :  { %1722 = vmatpush3.bf16.msra.mxu1 %v1951_v15  ;;  %v1388_v15 = vld [vmem:[%s2345_s4 + $0x8] sm:$0xff] }
  0x1c   :  { %1723 = vmatprep.subr.bf16.mxu1 %v1952_v16  ;;  %v1387_v16 = vld [vmem:[%s2345_s4] sm:$0xff] }
  0x1f   :  { %1724 = vmatpush3.bf16.msra.mxu1 %v1953_v17  ;;  %v1390_v17 = vld [vmem:[%s2345_s4 + $0x18] sm:$0xff] }
  0x20   :  { %359 = vmatprep.subr.bf16.mxu1 %v1975_v1 }
  0x22   :  { %343 = vmatmul.mubr.bf16.vlgmr.msra.gmra.mrb[0].mxu1 %v1954_v18  ;;  %v1389_v18 = vld [vmem:[%s2345_s4 + $0x10] sm:$0xff] }
  0x23   :  { %360 = vmatpush1.bf16.msra.mxu1 %v1957_v20  ;;  %350 = vmatprep.mubr.bf16.mxu1 %v1963_v21  ;;  %v1421_v20 = vld [vmem:[%s2346_s6] sm:$0xff] }
  0x24   :  { %361 = vmatprep.subr.bf16.mxu1 %v1975_v1  ;;  %v1518_v21 = vld [vmem:[%s2347_s8] sm:$0x7] }
  0x27   :  { %362 = vmatpush1.bf16.msra.mxu1 %v1958_v25 }
  0x28   :  { %363 = vmatprep.subr.bf16.mxu1 %v1975_v1 }
  0x2a   :  { %351 = vmatmul.mubr.bf16.gmra.mrb[4].mxu1 %v1965_v26  ;;  %v1641_v26 = vld [vmem:[%s2344_s3 + $0x38] sm:$0xff] }
  0x2b   :  { %364 = vmatpush1.bf16.msra.mxu1 %v1959_v27  ;;  %1636 = vmatprep.mubr.msk.bf16.mxu1 %vm303_vm0, %v1971_v28  ;;  %v416_v27 = vld [vmem:[%s2344_s3] sm:$0xff]  ;;  %v417_v28 = vld [vmem:[%s2344_s3 + $0x8] sm:$0xff] }
  0x2c   :  { %365 = vmatprep.subr.bf16.mxu1 %v1975_v1 }
  0x2f   :  { %366 = vmatpush1.bf16.msra.mxu1 %v1960_v29  ;;  %v418_v29 = vld [vmem:[%s2344_s3 + $0x10] sm:$0xff] }
  0x30   :  { %367 = vmatprep.subr.bf16.mxu1 %v1975_v1 }
  0x33   :  { %368 = vmatpush1.bf16.msra.mxu1 %v1961_v30 }
  0x34   :  { %369 = vmatprep.subr.bf16.mxu1 %v1975_v1 }
  0x37   :  { %370 = vmatpush1.bf16.msra.mxu1 %v1962_v31  ;;  %v419_v31 = vld [vmem:[%s2344_s3 + $0x18] sm:$0xff] }
  0x38   :  { %371 = vmatprep.subr.bf16.mxu1 %v1975_v1 }
  0x3b   :  { %372 = vmatpush1.bf16.msra.mxu1 %v1966_v32  ;;  %v1650_v32 = vld [vmem:[%s2344_s3 + $0x40] sm:$0xff] }
  0x3c   :  { %373 = vmatprep.subr.bf16.mxu1 %v1975_v1 }
  0x3f   :  { %374 = vmatpush1.bf16.msra.mxu1 %v1967_v33  ;;  %v1651_v33 = vld [vmem:[%s2344_s3 + $0x48] sm:$0xff] }
  0x40   :  { %375 = vmatprep.subr.bf16.mxu1 %v1975_v1 }
  0x43   :  { %376 = vmatpush1.bf16.msra.mxu1 %v1968_v34  ;;  %v1652_v34 = vld [vmem:[%s2344_s3 + $0x50] sm:$0xff] }
  0x46   :  { %392 = vmatmul.mubr.bf16.vlgmr.msra.gmra.mrb[8].mxu1 %v1969_v35 }
  0x47   :  { %1637 = vmatprep.mubr.msk.bf16.mxu1 %vm303_vm0, %v1972_v36  ;;  %v1653_v36 = vld [vmem:[%s2344_s3 + $0x58] sm:$0xff] }
  0x4e   :  { %400 = vmatmul.mubr.bf16.gmra.mrb[12].mxu1 %v1974_v37  ;;  %v1658_v37 = vld [vmem:[%s2344_s3 + $0x60] sm:$0xff] }
  0x86   :  { %v98_v50 = vpop.permute.xlu0 %97 }
  0x89   :  { %v108_v53 = vpop.permute.xlu1 %107 }
  0x8a   :  { %v103_v51 = vpop.permute.xlu0 %102 }
  0x8d   :  { %v113_v63 = vpop.permute.xlu1 %112 }
  0xf5   :  { %v1725_v38 = vpop.f32.mrb[0].mxu1 }
  0xf6   :  { %v1726_v39 = vpop.f32.mrb[1].mxu1 }
  0xf7   :  { %v1727_v40 = vadd.f32 %v1726_v39, %v1725_v38  ;;  %v1728_v41 = vpop.f32.mrb[2].mxu1  ;;  %v1659_v38 = vld [vmem:[%s2344_s3 + $0x68] sm:$0xff]  ;;  %v1660_v39 = vld [vmem:[%s2344_s3 + $0x70] sm:$0xff] }
  0xf8   :  { %v1729_v42 = vpop.f32.mrb[3].mxu1 }
  0xf9   :  { %v1730_v43 = vadd.f32 %v1729_v42, %v1728_v41  ;;  %v345_v52 = vadd.f32 %v1727_v40, %v98_v50  ;;  %v1661_v41 = vld [vmem:[%s2344_s3 + $0x78] sm:$0xff]  ;;  %v1666_v42 = vld [vmem:[%s2344_s3 + $0x80] sm:$0xff] }
  0xfb   :  { %v348_v55 = vadd.f32 %v1730_v43, %v103_v51  ;;  %v1667_v43 = vld [vmem:[%s2344_s3 + $0x88] sm:$0xff]  ;;  %v1677_v51 = vld [vmem:[%s2344_s3 + $0xb8] sm:$0xff] }
  0xfd   :  { %v1731_v44 = vpop.f32.mrb[4].mxu1 }
  0xfe   :  { %v1732_v45 = vpop.f32.mrb[5].mxu1 }
  0xff   :  { %v1733_v46 = vadd.f32 %v1732_v45, %v1731_v44  ;;  %v1734_v47 = vpop.f32.mrb[6].mxu1  ;;  %v1668_v44 = vld [vmem:[%s2344_s3 + $0x90] sm:$0xff] }
 0x100   :  { %v1735_v48 = vpop.f32.mrb[7].mxu1 }
 0x101   :  { %v1736_v49 = vadd.f32 %v1735_v48, %v1734_v47  ;;  %v353_v2 = vadd.f32 %v1733_v46, %v108_v53  ;;  %v1669_v46 = vld [vmem:[%s2344_s3 + $0x98] sm:$0xff]  ;;  %v1674_v47 = vld [vmem:[%s2344_s3 + $0xa0] sm:$0xff]  ;;  %v1675_v48 = vld [vmem:[%s2344_s3 + $0xa8] sm:$0xff] }
 0x102   :  { %v1683_v53 = vld [vmem:[%s2344_s3 + $0xc8] sm:$0xff] }
 0x103   :  { %v356_v4 = vadd.f32 %v1736_v49, %v113_v63  ;;  %v1676_v49 = vld [vmem:[%s2344_s3 + $0xb0] sm:$0xff] }
 0x104   :  { %v1700_v63 = vld [vmem:[%s2344_s3 + $0x110] sm:$0xff] }
 0x119   :  { %v393_v54 = vpop.f32.mrb[8].mxu1 }
 0x11a   :  { %v394_v56 = vadd.f32 %v393_v54, %v345_v52  ;;  %v395_v57 = vpop.f32.mrb[9].mxu1  ;;  %v1682_v52 = vld [vmem:[%s2344_s3 + $0xc0] sm:$0xff]  ;;  %v1684_v54 = vld [vmem:[%s2344_s3 + $0xd0] sm:$0xff] }
 0x11b   :  { %v396_v58 = vpop.f32.mrb[10].mxu1  ;;  %v1690_v57 = vld [vmem:[%s2344_s3 + $0xe0] sm:$0xff] }
 0x11c   :  { %v397_v59 = vadd.f32 %v396_v58, %v348_v55  ;;  %v398_v60 = vpop.f32.mrb[11].mxu1  ;;  %v408_v61 = vmax.f32 %v394_v56, 0.0  ;;  %v1685_v56 = vld [vmem:[%s2344_s3 + $0xd8] sm:$0xff]  ;;  %v1691_v58 = vld [vmem:[%s2344_s3 + $0xe8] sm:$0xff] }
 0x11d   :  { %v1693_v60 = vld [vmem:[%s2344_s3 + $0xf8] sm:$0xff] }
 0x11e   :  { %v409_v62 = vmax.f32 %v397_v59, 0.0  ;;  %v1692_v59 = vld [vmem:[%s2344_s3 + $0xf0] sm:$0xff] }
 0x120   :  { %v412_v1 = vadd.f32 %v409_v62, %v408_v61  ;;  %v1698_v61 = vld [vmem:[%s2344_s3 + $0x100] sm:$0xff]  ;;  %v1699_v62 = vld [vmem:[%s2344_s3 + $0x108] sm:$0xff] }
 0x121   :  { %v401_v3 = vpop.f32.mrb[12].mxu1 }
 0x122   :  { %v402_v5 = vadd.f32 %v401_v3, %v353_v2  ;;  %v403_v6 = vpop.f32.mrb[13].mxu1 }
 0x123   :  { %v404_v7 = vpop.f32.mrb[14].mxu1 }
 0x124   :  { %v410_v8 = vmax.f32 %v402_v5, 0.0  ;;  %v405_v9 = vadd.f32 %v404_v7, %v356_v4  ;;  %v406_v10 = vpop.f32.mrb[15].mxu1 }
 0x126   :  { %v413_v11 = vadd.f32 %v412_v1, %v410_v8  ;;  %v411_v12 = vmax.f32 %v405_v9, 0.0  ;;  %v1419_v1 = vld [vmem:[%s2348_s5] sm:$0xff] }
 0x128   :  { %v414_v13 = vadd.f32 %v413_v11, %v411_v12 }
 0x12a   :  { %v415_v14 = vmul.f32 0.25, %v414_v13 }
 0x12c   :  { %629 = vrot.lane.b32.xlu1 %v415_v14, %s1976_s19  ;;  %426 = vrot.lane.b32.xlu0 %v415_v14, %s1977_s20 }
 0x130   :  { %847 = vrot.lane.b32.xlu1 %v415_v14, %s1978_s2  ;;  %738 = vrot.lane.b32.xlu0 %v415_v14, %s1979_s21 }
 0x134   :  { %1065 = vrot.lane.b32.xlu1 %v415_v14, %s1980_s22  ;;  %956 = vrot.lane.b32.xlu0 %v415_v14, %s1981_s23 }
 0x138   :  { %1283 = vrot.lane.b32.xlu1 %v415_v14, %s1982_s24  ;;  %1174 = vrot.lane.b32.xlu0 %v415_v14, %s1983_s25 }
 0x13c   :  { %1398 = vperm.xlu1 %1937, %v1388_v15   ;;  %1393 = vperm.xlu0 %1936, %v1387_v16  }
 0x140   :  { %1408 = vperm.xlu1 %1937, %v1390_v17   ;;  %1403 = vperm.xlu0 %1936, %v1389_v18  }
 0x144   :  { %1430 = vperm.xlu1 %1937, %v1422_v19   ;;  %1425 = vperm.xlu0 %1936, %v1421_v20   ;;  %v1420_v20 = vld [vmem:[%s2348_s5 + $0x8] sm:$0xff] }
 0x148   :  { %1521 = vperm.xlu0 %1936, %v1518_v21   ;;  %v1984_v21 = vmov 0.0|0.0  }
 0x19e   :  { %v427_v22 = vpop.permute.xlu0 %426  ;;  %v630_v25 = vpop.permute.xlu1 %629 }
 0x19f   :  { %1791 = vmatprep.subr.mxu0 %v427_v22 }
 0x1a0   :  { %1792 = vmatpush3.msra.mxu0 %v427_v22  ;;  %v1986_v22 = vmov 0.0  }
 0x1a1   :  { %1794 = vmatmul.mubr.msk.f32.vlgmr.msra.gmra.mrb[0].mxu0 %vm429_vm1, %v1639_v23  ;;  %1799 = vmatprep.subr.mxu0 %v415_v14 }
 0x1a2   :  { %1800 = vmatpush3.msra.mxu0 %v415_v14  ;;  %1796 = vmatprep.mubr.msk.f32.mxu0 %vm429_vm1, %v1640_v24  ;;  %v739_v30 = vpop.permute.xlu0 %738  ;;  %v848_v35 = vpop.permute.xlu1 %847 }
 0x1a3   :  { %1807 = vmatprep.subr.mxu0 %v630_v25 }
 0x1a5   :  { %1797 = vmatmul.mubr.msk.f32.gmra.mrb[2].mxu0 %vm429_vm1, %v1641_v26 }
 0x1a6   :  { %1801 = vmatprep.mubr.msk.f32.mxu0 %vm429_vm1, %v416_v27  ;;  %v957_v40 = vpop.permute.xlu0 %956  ;;  %v1066_v45 = vpop.permute.xlu1 %1065 }
 0x1a9   :  { %1802 = vmatmul.mubr.msk.f32.vlgmr.msra.gmra.mrb[0].mxu0 %vm429_vm1, %v417_v28 }
 0x1aa   :  { %1808 = vmatpush3.msra.mxu0 %v630_v25  ;;  %1804 = vmatprep.mubr.msk.f32.mxu0 %vm429_vm1, %v418_v29  ;;  %v1175_v50 = vpop.permute.xlu0 %1174  ;;  %v1284_v55 = vpop.permute.xlu1 %1283 }
 0x1ab   :  { %1815 = vmatprep.subr.mxu0 %v739_v30 }
 0x1ad   :  { %1805 = vmatmul.mubr.msk.f32.gmra.mrb[2].mxu0 %vm429_vm1, %v419_v31 }
 0x1ae   :  { %1809 = vmatprep.mubr.msk.f32.mxu0 %vm429_vm1, %v1650_v32  ;;  %v1517_v32 = vld [vmem:[%s2349_s7] sm:$0x7] }
 0x1b1   :  { %1810 = vmatmul.mubr.msk.f32.vlgmr.msra.gmra.mrb[0].mxu0 %vm429_vm1, %v1651_v33 }
 0x1b2   :  { %1816 = vmatpush3.msra.mxu0 %v739_v30  ;;  %1812 = vmatprep.mubr.msk.f32.mxu0 %vm429_vm1, %v1652_v34 }
 0x1b3   :  { %1823 = vmatprep.subr.mxu0 %v848_v35 }
 0x1b5   :  { %1813 = vmatmul.mubr.msk.f32.gmra.mrb[2].mxu0 %vm429_vm1, %v1653_v36 }
 0x1b6   :  { %1817 = vmatprep.mubr.msk.f32.mxu0 %vm429_vm1, %v1658_v37 }
 0x1b9   :  { %1818 = vmatmul.mubr.msk.f32.vlgmr.msra.gmra.mrb[0].mxu0 %vm429_vm1, %v1659_v38 }
 0x1ba   :  { %1824 = vmatpush3.msra.mxu0 %v848_v35  ;;  %1820 = vmatprep.mubr.msk.f32.mxu0 %vm429_vm1, %v1660_v39 }
 0x1bb   :  { %1831 = vmatprep.subr.mxu0 %v957_v40  ;;  %v1399_v2 = vpop.permute.xlu1 %1398  ;;  %v1394_v3 = vpop.permute.xlu0 %1393 }
 0x1bd   :  { %1821 = vmatmul.mubr.msk.f32.gmra.mrb[2].mxu0 %vm429_vm1, %v1661_v41 }
 0x1be   :  { %1825 = vmatprep.mubr.msk.f32.mxu0 %vm429_vm1, %v1666_v42 }
 0x1bf   :  { %v1409_v9 = vpop.permute.xlu1 %1408  ;;  %v1404_v12 = vpop.permute.xlu0 %1403 }
 0x1c1   :  { %1826 = vmatmul.mubr.msk.f32.vlgmr.msra.gmra.mrb[0].mxu0 %vm429_vm1, %v1667_v43 }
 0x1c2   :  { %1832 = vmatpush3.msra.mxu0 %v957_v40  ;;  %1828 = vmatprep.mubr.msk.f32.mxu0 %vm429_vm1, %v1668_v44 }
 0x1c3   :  { %1839 = vmatprep.subr.mxu0 %v1066_v45  ;;  %v1431_v23 = vpop.permute.xlu1 %1430  ;;  %v1426_v25 = vpop.permute.xlu0 %1425 }
 0x1c5   :  { %1829 = vmatmul.mubr.msk.f32.gmra.mrb[2].mxu0 %vm429_vm1, %v1669_v46 }
 0x1c6   :  { %1833 = vmatprep.mubr.msk.f32.mxu0 %vm429_vm1, %v1674_v47 }
 0x1c7   :  { %v1522_v33 = vpop.permute.xlu0 %1521 }
 0x1c9   :  { %1834 = vmatmul.mubr.msk.f32.vlgmr.msra.gmra.mrb[0].mxu0 %vm429_vm1, %v1675_v48 }
 0x1ca   :  { %1840 = vmatpush3.msra.mxu0 %v1066_v45  ;;  %1836 = vmatprep.mubr.msk.f32.mxu0 %vm429_vm1, %v1676_v49 }
 0x1cb   :  { %1847 = vmatprep.subr.mxu0 %v1175_v50 }
 0x1cd   :  { %1837 = vmatmul.mubr.msk.f32.gmra.mrb[2].mxu0 %vm429_vm1, %v1677_v51 }
 0x1ce   :  { %1841 = vmatprep.mubr.msk.f32.mxu0 %vm429_vm1, %v1682_v52 }
 0x1d1   :  { %1842 = vmatmul.mubr.msk.f32.vlgmr.msra.gmra.mrb[0].mxu0 %vm429_vm1, %v1683_v53 }
 0x1d2   :  { %1848 = vmatpush3.msra.mxu0 %v1175_v50  ;;  %1844 = vmatprep.mubr.msk.f32.mxu0 %vm429_vm1, %v1684_v54 }
 0x1d3   :  { %1855 = vmatprep.subr.mxu0 %v1284_v55 }
 0x1d5   :  { %1845 = vmatmul.mubr.msk.f32.gmra.mrb[2].mxu0 %vm429_vm1, %v1685_v56 }
 0x1d6   :  { %1849 = vmatprep.mubr.msk.f32.mxu0 %vm429_vm1, %v1690_v57 }
 0x1d9   :  { %1850 = vmatmul.mubr.msk.f32.vlgmr.msra.gmra.mrb[0].mxu0 %vm429_vm1, %v1691_v58 }
 0x1da   :  { %1856 = vmatpush3.msra.mxu0 %v1284_v55  ;;  %1852 = vmatprep.mubr.msk.f32.mxu0 %vm429_vm1, %v1692_v59 }
 0x1dd   :  { %1853 = vmatmul.mubr.msk.f32.gmra.mrb[2].mxu0 %vm429_vm1, %v1693_v60 }
 0x1de   :  { %1857 = vmatprep.mubr.msk.f32.mxu0 %vm429_vm1, %v1698_v61 }
 0x1e1   :  { %1858 = vmatmul.mubr.msk.f32.vlgmr.msra.gmra.mrb[0].mxu0 %vm429_vm1, %v1699_v62 }
 0x1e2   :  { %1860 = vmatprep.mubr.msk.f32.mxu0 %vm429_vm1, %v1700_v63 }
 0x1e5   :  { %1861 = vmatmul.mubr.msk.f32.gmra.mrb[2].mxu0 %vm429_vm1, %v1701_v0 }
 0x1e6   :  { %1871 = vmatprep.mubr.msk.f32.mxu0 %vm1433_vm2, %v1419_v1 }
 0x2b4   :  { %v1859_v4 = vpop.f32.mrb[0].mxu0 }
 0x2b5   :  { %v1412_v5 = vadd.f32 %v1859_v4, %v1399_v2  ;;  %v1364_v6 = vpop.f32.mrb[1].mxu0 }
 0x2b6   :  { %v1411_v7 = vadd.f32 %v1394_v3, %v1364_v6 }
 0x2b7   :  { %v1416_v8 = vmax.f32 %v1412_v5, 0.0 }
 0x2b8   :  { %v1415_v10 = vmax.f32 %v1411_v7, 0.0  ;;  %v1862_v11 = vpop.f32.mrb[2].mxu0 }
 0x2b9   :  { %v1414_v13 = vadd.f32 %v1862_v11, %v1409_v9  ;;  %v1374_v14 = vpop.f32.mrb[3].mxu0 }
 0x2ba   :  { %v1881_v15 = vpack.c.bf16 %v1416_v8, %v1415_v10  ;;  %v1413_v16 = vadd.f32 %v1404_v12, %v1374_v14 }
 0x2bb   :  { %v1418_v17 = vmax.f32 %v1414_v13, 0.0 }
 0x2bc   :  { %v1417_v18 = vmax.f32 %v1413_v16, 0.0  ;;  %1882 = vmatprep.subr.bf16.mxu0 %v1881_v15 }
 0x2bd   :  { %1884 = vmatpush3.bf16.msra.mxu0 %v1881_v15 }
 0x2be   :  { %v1885_v19 = vpack.c.bf16 %v1418_v17, %v1417_v18 }
 0x2c0   :  { %1886 = vmatprep.subr.bf16.mxu0 %v1885_v19 }
 0x2c1   :  { %1888 = vmatpush3.bf16.msra.mxu0 %v1885_v19 }
 0x2c2   :  { %1889 = vmatprep.subr.bf16.mxu0 %v1984_v21 }
 0x2c4   :  { %1872 = vmatmul.mubr.msk.f32.vlgmr.msra.gmra.mrb[4].mxu0 %vm1433_vm2, %v1420_v20 }
 0x2c5   :  { %1878 = vmatprep.mubr.msk.f32.mxu0 %vm1985_vm3, %v1986_v22 }
 0x397   :  { %v1873_v24 = vpop.f32.mrb[4].mxu0 }
 0x398   :  { %v1512_v26 = vadd.f32 %v1873_v24, %v1431_v23  ;;  %v1506_v27 = vpop.f32.mrb[5].mxu0 }
 0x399   :  { %v1507_v28 = vadd.f32 %v1506_v27, %v1426_v25 }
 0x39a   :  { %v1516_v29 = vmax.f32 %v1512_v26, 0.0 }
 0x39b   :  { %v1515_v30 = vmax.f32 %v1507_v28, 0.0 }
 0x39d   :  { %v1890_v31 = vpack.c.bf16 %v1516_v29, %v1515_v30 }
 0x39f   :  { %1891 = vmatpush3.bf16.msra.mxu0 %v1890_v31 }
 0x3a2   :  { %1879 = vmatmul.mubr.msk.f32.vlgmr.msra.gmra.mrb[6].mxu0 %vm303_vm0, %v1517_v32 }
 0x475   :  { %v1593_v34 = vpop.f32.mrb[6].mxu0 }
 0x476   :  { %v1594_v35 = vadd.f32 %v1593_v34, %v1522_v33  ;;  %v1880_v36 = vpop.f32.mrb[7].mxu0 }
 0x478   :  { %1598 = vst.msk [vmem:[%s2350_s9] sm:$0x7] %vm1597_vm4, %v1594_v35 }

</bundles_post_ra>
